<compile_context>
chip_gen: v7x
topology: tpu7x:2x2x1
jax: 0.10.0
libtpu: 0.0.40
codegen_flags: <defaults>
</compile_context>

<pallas_src>
import functools

import jax
import jax.numpy as jnp
from jax import lax
from jax.experimental import pallas as pl
from jax.experimental.pallas import tpu as pltpu


def _round_up(x: int, m: int) -> int:
    return ((x + m - 1) // m) * m


def _choose_tile_b(b_pad: int, max_tile: int = 16384, min_steps: int = 8) -> int:
    """Batch tile (lane axis, multiple of 128).

    Large enough to amortize per-step pipeline overhead, small enough that moderate B
    still yields >= min_steps grid steps (so the 'parallel' batch axis can be sharded
    across v7x's two TensorCores).  Never exceeds the (128-padded) batch itself.
    """
    t = _round_up(pl.cdiv(b_pad, min_steps), 128)
    return max(128, min(max_tile, t, b_pad))


def encoder_y_kernel(y_ref, w1_ref, b1_ref, w2_ref, b2_ref, w3_ref, b3_ref,
                     out_ref):
    """Fused 3-layer MLP, feature-major compute (batch on the lane axis).

    Per grid step (TILE_B batch elements):
      y_ref : (TILE_B, y_dim)   f32  (natural layout; cast to bf16 in-kernel)
      w1    : (hid,    y_dim)   bf16   b1: (hid, 1)      f32
      w2    : (hid,    hid)     bf16   b2: (hid, 1)      f32
      w3    : (2*w_dim, hid)    bf16   b3: (2*w_dim, 1)  f32  (mu rows first)
      out   : (2*w_dim, TILE_B) f32   (lane-dense store)
    """
    y = y_ref[...].astype(jnp.bfloat16)                       # (TILE_B, y_dim)
    # h1 = W1 @ y^T : contract dim 1 of w1 with dim 1 of y -> (hid, TILE_B).
    h1 = lax.dot_general(w1_ref[...], y, (((1,), (1,)), ((), ())),
                         preferred_element_type=jnp.float32) + b1_ref[...]
    h1 = jnp.maximum(h1, 0.0).astype(jnp.bfloat16)            # ReLU, bf16 for next MXU op
    h2 = jnp.dot(w2_ref[...], h1, preferred_element_type=jnp.float32) + b2_ref[...]
    h2 = jnp.maximum(h2, 0.0).astype(jnp.bfloat16)
    out_ref[...] = (jnp.dot(w3_ref[...], h2, preferred_element_type=jnp.float32)
                    + b3_ref[...])                            # lane-dense f32 store


def prepare_params(raw, w_dim):
    """Convert PyTorch-layout f32 params into the kernel layout.

    raw: w1 (hid, y_dim), b1 (hid,), w2 (hid, hid), b2 (hid,),
         w3 (2*w_dim, hid), b3 (2*w_dim,)   -- exactly nn.Linear's (out, in) layout.

    De-interleaves mu/logvar: PyTorch's view(-1, w_dim, 2).unbind(-1) means
    mu = even output features, logvar = odd output features; we permute the rows of
    w3/b3 once here (zero runtime cost) so the kernel output is [mu rows ; logvar rows].
    """
    out_dim = 2 * w_dim
    perm = jnp.concatenate([jnp.arange(0, out_dim, 2), jnp.arange(1, out_dim, 2)])
    return {
        "w1": raw["w1"].astype(jnp.bfloat16),
        "b1": raw["b1"].reshape(-1, 1).astype(jnp.float32),
        "w2": raw["w2"].astype(jnp.bfloat16),
        "b2": raw["b2"].reshape(-1, 1).astype(jnp.float32),
        "w3": raw["w3"][perm].astype(jnp.bfloat16),
        "b3": raw["b3"][perm].reshape(-1, 1).astype(jnp.float32),
    }


def encoder_y_forward(y, kp, *, w_dim, batch_major=False):
    """Runs the fused kernel.

    Returns (mu, logvar).  By default they are FEATURE-MAJOR, shape (w_dim, B), which
    avoids an extra HBM transpose pass on this memory-bound kernel; pass
    batch_major=True for the PyTorch-identical (B, w_dim) layout.
    """
    B, y_dim = y.shape
    hid = kp["w1"].shape[0]
    out_dim = 2 * w_dim

    # Pad only to the 128-lane multiple, and only if needed (no tile-sized pad pass).
    b_pad = _round_up(B, 128)
    if b_pad != B:
        y = jnp.pad(y, ((0, b_pad - B), (0, 0)))
    tile_b = _choose_tile_b(b_pad)
    grid = (pl.cdiv(b_pad, tile_b),)  # ragged last block: OOB writes are masked

    flops = 2 * b_pad * (y_dim * hid + hid * hid + hid * out_dim)
    bytes_accessed = (
        b_pad * y_dim * y.dtype.itemsize
        + sum(int(kp[k].size) * kp[k].dtype.itemsize for k in kp)
        + out_dim * b_pad * 4
    )

    resident = lambda i: (0, 0)  # weights/biases: same block every grid step
    out_t = pl.pallas_call(
        encoder_y_kernel,
        out_shape=jax.ShapeDtypeStruct((out_dim, b_pad), jnp.float32),
        grid=grid,
        in_specs=[
            pl.BlockSpec((tile_b, y_dim), lambda i: (i, 0)),   # y, natural layout
            pl.BlockSpec((hid, y_dim), resident),              # w1
            pl.BlockSpec((hid, 1), resident),                  # b1
            pl.BlockSpec((hid, hid), resident),                # w2
            pl.BlockSpec((hid, 1), resident),                  # b2
            pl.BlockSpec((out_dim, hid), resident),            # w3 (mu rows first)
            pl.BlockSpec((out_dim, 1), resident),              # b3
        ],
        out_specs=pl.BlockSpec((out_dim, tile_b), lambda i: (0, i)),
        compiler_params=pltpu.CompilerParams(
            dimension_semantics=("parallel",),                 # shard batch over v7x's 2 TCs
        ),
        cost_estimate=pl.CostEstimate(
            flops=flops, transcendentals=0, bytes_accessed=bytes_accessed),
    )(y, kp["w1"], kp["b1"], kp["w2"], kp["b2"], kp["w3"], kp["b3"])

    # Contiguous, already-de-interleaved feature-major slices; drop batch padding.
    mu = out_t[:w_dim, :B]
    logvar = out_t[w_dim:, :B]
    if batch_major:
        # PyTorch-identical layout; costs one extra HBM pass -- prefer fusing the
        # transpose into the consumer instead.
        mu, logvar = mu.T, logvar.T
    return mu, logvar


# ---------------------------------------------------------------------------
# Reference / test harness
# ---------------------------------------------------------------------------

def init_raw_params(key, y_dim, hid_dim, w_dim):
    """Synthetic f32 params in PyTorch nn.Linear layout (out_features, in_features)."""
    ks = jax.random.split(key, 6)
    s = 0.1
    return {
        "w1": s * jax.random.normal(ks[0], (hid_dim, y_dim), jnp.float32),
        "b1": s * jax.random.normal(ks[1], (hid_dim,), jnp.float32),
        "w2": s * jax.random.normal(ks[2], (hid_dim, hid_dim), jnp.float32),
        "b2": s * jax.random.normal(ks[3], (hid_dim,), jnp.float32),
        "w3": s * jax.random.normal(ks[4], (2 * w_dim, hid_dim), jnp.float32),
        "b3": s * jax.random.normal(ks[5], (2 * w_dim,), jnp.float32),
    }


def reference_forward(y, raw, w_dim):
    """Pure-JAX f32 mirror of the PyTorch module (interleaved mu/logvar unbind)."""
    h1 = jnp.maximum(y @ raw["w1"].T + raw["b1"], 0.0)
    h2 = jnp.maximum(h1 @ raw["w2"].T + raw["b2"], 0.0)
    out = h2 @ raw["w3"].T + raw["b3"]
    ml = out.reshape(-1, w_dim, 2)
    return ml[..., 0], ml[..., 1]


if __name__ == "__main__":
    # Small shapes consistent with the module: y is (batch, y_dim).
    batch, y_dim, hid_dim, w_dim = 2, 8, 32, 4

    key = jax.random.PRNGKey(0)
    k_y, k_p = jax.random.split(key)
    y = jax.random.normal(k_y, (batch, y_dim), jnp.float32)

    raw = init_raw_params(k_p, y_dim, hid_dim, w_dim)
    kparams = prepare_params(raw, w_dim)

    fwd = jax.jit(functools.partial(encoder_y_forward, w_dim=w_dim))
    mu_fm, logvar_fm = fwd(y, kparams)           # feature-major: (w_dim, batch)
    jax.block_until_ready((mu_fm, logvar_fm))

    mu_ref, logvar_ref = reference_forward(y, raw, w_dim)
    assert mu_fm.shape == (w_dim, batch) and logvar_fm.shape == (w_dim, batch)
    # Transpose here only to compare against the PyTorch-layout reference; in a real
    # pipeline the consumer works feature-major (or fuses the transpose).
    mu, logvar = mu_fm.T, logvar_fm.T
    # bf16 matmul inputs with f32 accumulation -> loose-but-tight-enough tolerance.
    assert jnp.allclose(mu, mu_ref, atol=2e-2, rtol=2e-2), jnp.max(jnp.abs(mu - mu_ref))
    assert jnp.allclose(logvar, logvar_ref, atol=2e-2, rtol=2e-2), jnp.max(jnp.abs(logvar - logvar_ref))

    print("KERNEL_OK")
</pallas_src>

<mosaic_0001>
module attributes {stable_mosaic.version = 11 : i64} {
  func.func @encoder_y_kernel(%arg0: i32, %arg1: memref<128x8xf32, #tpu.memory_space<vmem>>, %arg2: memref<32x8xbf16, #tpu.memory_space<vmem>>, %arg3: memref<32x1xf32, #tpu.memory_space<vmem>>, %arg4: memref<32x32xbf16, #tpu.memory_space<vmem>>, %arg5: memref<32x1xf32, #tpu.memory_space<vmem>>, %arg6: memref<8x32xbf16, #tpu.memory_space<vmem>>, %arg7: memref<8x1xf32, #tpu.memory_space<vmem>>, %arg8: memref<8x128xf32, #tpu.memory_space<vmem>>) attributes {dimension_semantics = [#tpu.dimension_semantics<parallel>], iteration_bounds = array<i64: 1>, scalar_prefetch = 0 : i64, scratch_operands = 0 : i64, tpu.core_type = #tpu.core_type<tc>, window_params = [{transform_indices = @transform_0, window_bounds = array<i64: 128, 8>}, {pipeline_mode = #tpu.pipeline_mode<synchronous>, transform_indices = @transform_1, window_bounds = array<i64: 32, 8>}, {pipeline_mode = #tpu.pipeline_mode<synchronous>, transform_indices = @transform_2, window_bounds = array<i64: 32, 1>}, {pipeline_mode = #tpu.pipeline_mode<synchronous>, transform_indices = @transform_3, window_bounds = array<i64: 32, 32>}, {pipeline_mode = #tpu.pipeline_mode<synchronous>, transform_indices = @transform_4, window_bounds = array<i64: 32, 1>}, {pipeline_mode = #tpu.pipeline_mode<synchronous>, transform_indices = @transform_5, window_bounds = array<i64: 8, 32>}, {pipeline_mode = #tpu.pipeline_mode<synchronous>, transform_indices = @transform_6, window_bounds = array<i64: 8, 1>}, {transform_indices = @transform_7, window_bounds = array<i64: 8, 128>}]} {
    %c0 = arith.constant 0 : index
    %c0_0 = arith.constant 0 : index
    %0 = vector.load %arg1[%c0, %c0_0] : memref<128x8xf32, #tpu.memory_space<vmem>>, vector<128x8xf32>
    %1 = arith.truncf %0 : vector<128x8xf32> to vector<128x8xbf16>
    %c0_1 = arith.constant 0 : index
    %c0_2 = arith.constant 0 : index
    %2 = vector.load %arg2[%c0_1, %c0_2] : memref<32x8xbf16, #tpu.memory_space<vmem>>, vector<32x8xbf16>
    %cst = arith.constant dense<0.000000e+00> : vector<32x128xf32>
    %3 = tpu.matmul %2, %1, %cst {dimension_numbers = #tpu.dot_dimension_numbers<[1], [1], [0], [0], [0, 0, 1, 0], [], []>} : vector<32x8xbf16>, vector<128x8xbf16>, vector<32x128xf32> -> vector<32x128xf32>
    %c0_3 = arith.constant 0 : index
    %c0_4 = arith.constant 0 : index
    %4 = vector.load %arg3[%c0_3, %c0_4] : memref<32x1xf32, #tpu.memory_space<vmem>>, vector<32x1xf32>
    %5 = vector.broadcast %4 : vector<32x1xf32> to vector<32x128xf32>
    %6 = arith.addf %3, %5 : vector<32x128xf32>
    %cst_5 = arith.constant 0.000000e+00 : f32
    %7 = vector.broadcast %cst_5 : f32 to vector<32x128xf32>
    %8 = arith.maximumf %6, %7 : vector<32x128xf32>
    %9 = arith.truncf %8 : vector<32x128xf32> to vector<32x128xbf16>
    %c0_6 = arith.constant 0 : index
    %c0_7 = arith.constant 0 : index
    %10 = vector.load %arg4[%c0_6, %c0_7] : memref<32x32xbf16, #tpu.memory_space<vmem>>, vector<32x32xbf16>
    %cst_8 = arith.constant dense<0.000000e+00> : vector<32x128xf32>
    %11 = tpu.matmul %10, %9, %cst_8 {dimension_numbers = #tpu.dot_dimension_numbers<[1], [0], [0], [1], [0, 0, 1, 1], [], []>} : vector<32x32xbf16>, vector<32x128xbf16>, vector<32x128xf32> -> vector<32x128xf32>
    %c0_9 = arith.constant 0 : index
    %c0_10 = arith.constant 0 : index
    %12 = vector.load %arg5[%c0_9, %c0_10] : memref<32x1xf32, #tpu.memory_space<vmem>>, vector<32x1xf32>
    %13 = vector.broadcast %12 : vector<32x1xf32> to vector<32x128xf32>
    %14 = arith.addf %11, %13 : vector<32x128xf32>
    %cst_11 = arith.constant 0.000000e+00 : f32
    %15 = vector.broadcast %cst_11 : f32 to vector<32x128xf32>
    %16 = arith.maximumf %14, %15 : vector<32x128xf32>
    %17 = arith.truncf %16 : vector<32x128xf32> to vector<32x128xbf16>
    %c0_12 = arith.constant 0 : index
    %c0_13 = arith.constant 0 : index
    %18 = vector.load %arg6[%c0_12, %c0_13] : memref<8x32xbf16, #tpu.memory_space<vmem>>, vector<8x32xbf16>
    %cst_14 = arith.constant dense<0.000000e+00> : vector<8x128xf32>
    %19 = tpu.matmul %18, %17, %cst_14 {dimension_numbers = #tpu.dot_dimension_numbers<[1], [0], [0], [1], [0, 0, 1, 1], [], []>} : vector<8x32xbf16>, vector<32x128xbf16>, vector<8x128xf32> -> vector<8x128xf32>
    %c0_15 = arith.constant 0 : index
    %c0_16 = arith.constant 0 : index
    %20 = vector.load %arg7[%c0_15, %c0_16] : memref<8x1xf32, #tpu.memory_space<vmem>>, vector<8x1xf32>
    %21 = vector.broadcast %20 : vector<8x1xf32> to vector<8x128xf32>
    %22 = arith.addf %19, %21 : vector<8x128xf32>
    %c0_17 = arith.constant 0 : index
    %c0_18 = arith.constant 0 : index
    %23 = vector.load %arg8[%c0_17, %c0_18] : memref<8x128xf32, #tpu.memory_space<vmem>>, vector<8x128xf32>
    tpu.vector_store %arg8[%c0_17, %c0_18], %22 {strides = array<i32>} : memref<8x128xf32, #tpu.memory_space<vmem>>, vector<8x128xf32>,
    return
  }
  func.func @transform_0(%arg0: i32) -> (i32, i32) {
    %c0_i32 = arith.constant 0 : i32
    %c0_i32_0 = arith.constant 0 : i32
    return %arg0, %c0_i32 : i32, i32
  }
  func.func @transform_1(%arg0: i32) -> (i32, i32) {
    %c0_i32 = arith.constant 0 : i32
    %c0_i32_0 = arith.constant 0 : i32
    %c0_i32_1 = arith.constant 0 : i32
    return %c0_i32, %c0_i32_0 : i32, i32
  }
  func.func @transform_2(%arg0: i32) -> (i32, i32) {
    %c0_i32 = arith.constant 0 : i32
    %c0_i32_0 = arith.constant 0 : i32
    %c0_i32_1 = arith.constant 0 : i32
    return %c0_i32, %c0_i32_0 : i32, i32
  }
  func.func @transform_3(%arg0: i32) -> (i32, i32) {
    %c0_i32 = arith.constant 0 : i32
    %c0_i32_0 = arith.constant 0 : i32
    %c0_i32_1 = arith.constant 0 : i32
    return %c0_i32, %c0_i32_0 : i32, i32
  }
  func.func @transform_4(%arg0: i32) -> (i32, i32) {
    %c0_i32 = arith.constant 0 : i32
    %c0_i32_0 = arith.constant 0 : i32
    %c0_i32_1 = arith.constant 0 : i32
    return %c0_i32, %c0_i32_0 : i32, i32
  }
  func.func @transform_5(%arg0: i32) -> (i32, i32) {
    %c0_i32 = arith.constant 0 : i32
    %c0_i32_0 = arith.constant 0 : i32
    %c0_i32_1 = arith.constant 0 : i32
    return %c0_i32, %c0_i32_0 : i32, i32
  }
  func.func @transform_6(%arg0: i32) -> (i32, i32) {
    %c0_i32 = arith.constant 0 : i32
    %c0_i32_0 = arith.constant 0 : i32
    %c0_i32_1 = arith.constant 0 : i32
    return %c0_i32, %c0_i32_0 : i32, i32
  }
  func.func @transform_7(%arg0: i32) -> (i32, i32) {
    %c0_i32 = arith.constant 0 : i32
    %c0_i32_0 = arith.constant 0 : i32
    return %c0_i32, %arg0 : i32, i32
  }
}

</mosaic_0001>

<bundles_post_ra>
// kernel: encoder_y_forward.1
= control target key start
LH: loop header
LB: loop body
LE: loop exit
PB: predicated region body
PF: predicated region fallthrough
CT: control target
= control target key end

     0   :  { %vm89_vm0 = vcmask 64512   ;;  %v409_v3 = vmov 0   ;;  %vm213_vm1 = vcmask 261120   ;;  %vm411_vm2 = vmmov 0   ;;  %s566_s0 = inlined_call_operand.vmem [shape: f32[128,8], index: 0, kind: input, shape index: {}]   ;;  %s567_s1 = inlined_call_operand.vmem [shape: bf16[32,8], index: 1, kind: input, shape index: {}]   ;;  %s568_s2 = inlined_call_operand.vmem [shape: f32[32,1], index: 2, kind: input, shape index: {}]   ;;  %s569_s4 = inlined_call_operand.vmem [shape: f32[32,1], index: 4, kind: input, shape index: {}]   ;;  %s570_s6 = inlined_call_operand.vmem [shape: f32[8,1], index: 6, kind: input, shape index: {}]   ;;  %s571_s3 = inlined_call_operand.vmem [shape: bf16[32,32], index: 3, kind: input, shape index: {}]   ;;  %s572_s5 = inlined_call_operand.vmem [shape: bf16[8,32], index: 5, kind: input, shape index: {}]   ;;  %s573_s7 = inlined_call_operand.vmem [shape: f32[8,128], index: 7, kind: output, shape index: {}]  }
   0x1   :  { %v27_v0 = vld [vmem:[%s566_s0] sm:$0xff]  ;;  %v28_v1 = vld [vmem:[%s566_s0 + $0x8] sm:$0xff]  ;;  %v29_v2 = vld [vmem:[%s566_s0 + $0x10] sm:$0xff]  ;;  %403 = vset.pattern.permute.xlu0 %v409_v3  ;;  %404 = vset.pattern.permute.xlu1 %v409_v3 }
   0x2   :  { %v43_v4 = vpack.c.bf16 %v28_v1, %v27_v0  ;;  %v30_v5 = vld [vmem:[%s566_s0 + $0x18] sm:$0xff]  ;;  %v31_v8 = vld [vmem:[%s566_s0 + $0x20] sm:$0xff]  ;;  %v32_v9 = vld [vmem:[%s566_s0 + $0x28] sm:$0xff]  ;;  %v410_v0 = vmov 0.0  }
   0x3   :  { %v44_v6 = vpack.c.bf16 %v30_v5, %v29_v2  ;;  %v405_v10 = vld [vmem:[%s567_s1] sm:$0xff]   ;;  %v57_v12 = vld [vmem:[%s568_s2 + $0x10] sm:$0xff]  ;;  %v45_v14 = vpack.c.bf16 %v32_v9, %v31_v8  ;;  %v56_v15 = vld [vmem:[%s568_s2 + $0x8] sm:$0xff] }
   0x4   :  { %392 = vmatprep.subr.msk.bf16.mxu0 %vm89_vm0, %v43_v4  ;;  %v97_v7 = vsel %vm89_vm0, %v43_v4, 0  ;;  %v55_v11 = vld [vmem:[%s568_s2] sm:$0xff]  ;;  %372 = vmatprep.mubr.msk.bf16.mxu0 %vm89_vm0, %v405_v10  ;;  %v58_v16 = vld [vmem:[%s568_s2 + $0x18] sm:$0xff]  ;;  %v33_v18 = vld [vmem:[%s566_s0 + $0x30] sm:$0xff] }
   0x5   :  { %357 = vmatpush3.bf16.xpose.msra.mxu0 %v97_v7  ;;  %61 = vperm.xlu0 %403, %v55_v11   ;;  %v100_v13 = vsel %vm89_vm0, %v44_v6, 0  ;;  %v179_v17 = vld [vmem:[%s569_s4] sm:$0xff]  ;;  %v34_v19 = vld [vmem:[%s566_s0 + $0x38] sm:$0xff]  ;;  %v180_v20 = vld [vmem:[%s569_s4 + $0x8] sm:$0xff]  ;;  %v103_v21 = vsel %vm89_vm0, %v45_v14, 0 }
   0x6   :  { %393 = vmatprep.subr.msk.bf16.mxu0 %vm89_vm0, %v44_v6  ;;  %71 = vperm.xlu1 %404, %v57_v12   ;;  %v46_v22 = vpack.c.bf16 %v34_v19, %v33_v18  ;;  %v181_v23 = vld [vmem:[%s569_s4 + $0x10] sm:$0xff]  ;;  %v182_v24 = vld [vmem:[%s569_s4 + $0x18] sm:$0xff]  ;;  %v276_v25 = vld [vmem:[%s570_s6] sm:$0xff] }
   0x7   :  { %v35_v26 = vld [vmem:[%s566_s0 + $0x40] sm:$0xff]  ;;  %v36_v27 = vld [vmem:[%s566_s0 + $0x48] sm:$0xff]  ;;  %v37_v30 = vld [vmem:[%s566_s0 + $0x50] sm:$0xff] }
   0x8   :  { %v106_v28 = vsel %vm89_vm0, %v46_v22, 0  ;;  %v47_v29 = vpack.c.bf16 %v36_v27, %v35_v26  ;;  %v38_v31 = vld [vmem:[%s566_s0 + $0x58] sm:$0xff]  ;;  %v39_v34 = vld [vmem:[%s566_s0 + $0x60] sm:$0xff]  ;;  %v40_v35 = vld [vmem:[%s566_s0 + $0x68] sm:$0xff] }
   0x9   :  { %66 = vperm.xlu0 %403, %v56_v15   ;;  %v48_v33 = vpack.c.bf16 %v38_v31, %v37_v30  ;;  %v49_v37 = vpack.c.bf16 %v40_v35, %v39_v34  ;;  %v41_v38 = vld [vmem:[%s566_s0 + $0x70] sm:$0xff]  ;;  %v42_v39 = vld [vmem:[%s566_s0 + $0x78] sm:$0xff]  ;;  %v406_v43 = vld [vmem:[%s567_s1 + $0x8] sm:$0xff]  }
   0xa   :  { %76 = vperm.xlu1 %404, %v58_v16   ;;  %v109_v32 = vsel %vm89_vm0, %v47_v29, 0  ;;  %v50_v41 = vpack.c.bf16 %v42_v39, %v41_v38  ;;  %v407_v44 = vld [vmem:[%s571_s3] sm:$0xff]   ;;  %v408_v63 = vld [vmem:[%s571_s3 + $0x8] sm:$0xff]  }
   0xb   :  { %v112_v36 = vsel %vm89_vm0, %v48_v33, 0  ;;  %v115_v40 = vsel %vm89_vm0, %v49_v37, 0  ;;  %380 = vmatprep.mubr.msk.bf16.mxu1 %vm213_vm1, %v407_v44  ;;  %v275_v19 = vld [vmem:[%s572_s5] sm:$0xf] }
   0xc   :  { %v118_v42 = vsel %vm89_vm0, %v50_v41, 0 }
   0xd   :  { %359 = vmatpush3.bf16.xpose.msra.mxu0 %v100_v13  ;;  %185 = vperm.xlu0 %403, %v179_v17  }
   0xe   :  { %394 = vmatprep.subr.msk.bf16.mxu0 %vm89_vm0, %v45_v14  ;;  %190 = vperm.xlu1 %404, %v180_v20  }
  0x11   :  { %195 = vperm.xlu0 %403, %v181_v23  }
  0x12   :  { %200 = vperm.xlu1 %404, %v182_v24  }
  0x15   :  { %361 = vmatpush3.bf16.xpose.msra.mxu0 %v103_v21  ;;  %279 = vperm.xlu0 %403, %v276_v25  }
  0x16   :  { %395 = vmatprep.subr.msk.bf16.mxu0 %vm89_vm0, %v46_v22 }
  0x1d   :  { %363 = vmatpush3.bf16.xpose.msra.mxu0 %v106_v28 }
  0x1e   :  { %396 = vmatprep.subr.msk.bf16.mxu0 %vm89_vm0, %v47_v29 }
  0x25   :  { %365 = vmatpush3.bf16.xpose.msra.mxu0 %v109_v32 }
  0x26   :  { %397 = vmatprep.subr.msk.bf16.mxu0 %vm89_vm0, %v48_v33 }
  0x2d   :  { %367 = vmatpush3.bf16.xpose.msra.mxu0 %v112_v36 }
  0x2e   :  { %398 = vmatprep.subr.msk.bf16.mxu0 %vm89_vm0, %v49_v37 }
  0x35   :  { %369 = vmatpush3.bf16.xpose.msra.mxu0 %v115_v40 }
  0x36   :  { %399 = vmatprep.subr.msk.bf16.mxu0 %vm89_vm0, %v50_v41 }
  0x3d   :  { %371 = vmatpush3.bf16.xpose.msra.mxu0 %v118_v42 }
  0x44   :  { %373 = vmatmul.mubr.msk.bf16.vlgmr.msra.gmra.mrb[0].mxu0 %vm89_vm0, %v406_v43 }
  0x84   :  { %v62_v46 = vpop.permute.xlu0 %61 }
  0x85   :  { %v72_v45 = vpop.permute.xlu1 %71 }
  0x88   :  { %v67_v53 = vpop.permute.xlu0 %66 }
  0x89   :  { %v77_v50 = vpop.permute.xlu1 %76 }
  0x8c   :  { %v186_v1 = vpop.permute.xlu0 %185 }
  0x8d   :  { %v191_v2 = vpop.permute.xlu1 %190 }
  0x90   :  { %v196_v3 = vpop.permute.xlu0 %195 }
  0x91   :  { %v201_v7 = vpop.permute.xlu1 %200 }
  0x94   :  { %v280_v20 = vpop.permute.xlu0 %279 }
 0x117   :  { %v374_v47 = vpop.f32.mrb[0].mxu0 }
 0x118   :  { %v163_v48 = vadd.f32 %v374_v47, %v72_v45  ;;  %v154_v49 = vpop.f32.mrb[1].mxu0 }
 0x119   :  { %v155_v51 = vadd.f32 %v154_v49, %v62_v46  ;;  %v375_v52 = vpop.f32.mrb[2].mxu0 }
 0x11a   :  { %v166_v54 = vadd.f32 %v375_v52, %v77_v50  ;;  %v157_v55 = vpop.f32.mrb[3].mxu0  ;;  %v171_v57 = vmax.f32 %v163_v48, 0.0 }
 0x11b   :  { %v158_v56 = vadd.f32 %v157_v55, %v67_v53  ;;  %v169_v59 = vmax.f32 %v155_v51, 0.0 }
 0x11c   :  { %v172_v58 = vmax.f32 %v166_v54, 0.0 }
 0x11d   :  { %v170_v60 = vmax.f32 %v158_v56, 0.0 }
 0x11e   :  { %v174_v61 = vpack.c.bf16 %v172_v58, %v171_v57 }
 0x11f   :  { %v173_v62 = vpack.c.bf16 %v170_v60, %v169_v59 }
 0x121   :  { %376 = vmatprep.subr.bf16.mxu1 %v173_v62 }
 0x122   :  { %377 = vmatpush3.bf16.msra.mxu1 %v173_v62 }
 0x123   :  { %378 = vmatprep.subr.bf16.mxu1 %v174_v61 }
 0x126   :  { %379 = vmatpush3.bf16.msra.mxu1 %v174_v61 }
 0x127   :  { %384 = vmatprep.subr.bf16.mxu1 %v410_v0 }
 0x129   :  { %381 = vmatmul.mubr.msk.bf16.vlgmr.msra.gmra.mrb[0].mxu1 %vm213_vm1, %v408_v63 }
 0x12a   :  { %388 = vmatprep.mubr.msk.bf16.mxu1 %vm411_vm2, %v410_v0 }
 0x1fc   :  { %v382_v4 = vpop.f32.mrb[0].mxu1 }
 0x1fd   :  { %v263_v5 = vadd.f32 %v382_v4, %v196_v3  ;;  %v254_v6 = vpop.f32.mrb[1].mxu1 }
 0x1fe   :  { %v255_v8 = vadd.f32 %v254_v6, %v186_v1  ;;  %v383_v9 = vpop.f32.mrb[2].mxu1 }
 0x1ff   :  { %v266_v10 = vadd.f32 %v383_v9, %v201_v7  ;;  %v257_v11 = vpop.f32.mrb[3].mxu1  ;;  %v271_v13 = vmax.f32 %v263_v5, 0.0 }
 0x200   :  { %v258_v12 = vadd.f32 %v257_v11, %v191_v2  ;;  %v269_v15 = vmax.f32 %v255_v8, 0.0 }
 0x201   :  { %v272_v14 = vmax.f32 %v266_v10, 0.0 }
 0x202   :  { %v270_v16 = vmax.f32 %v258_v12, 0.0 }
 0x203   :  { %v274_v17 = vpack.c.bf16 %v272_v14, %v271_v13 }
 0x204   :  { %v273_v18 = vpack.c.bf16 %v270_v16, %v269_v15 }
 0x206   :  { %385 = vmatpush3.bf16.msra.mxu1 %v273_v18 }
 0x207   :  { %386 = vmatprep.subr.bf16.mxu1 %v410_v0 }
 0x20a   :  { %387 = vmatpush3.bf16.msra.mxu1 %v274_v17 }
 0x20d   :  { %389 = vmatmul.mubr.msk.bf16.vlgmr.msra.gmra.mrb[4].mxu1 %vm213_vm1, %v275_v19 }
 0x2e0   :  { %v319_v21 = vpop.f32.mrb[4].mxu1 }
 0x2e1   :  { %v320_v22 = vadd.f32 %v319_v21, %v280_v20  ;;  %v390_v23 = vpop.f32.mrb[5].mxu1 }
 0x2e2   :  { %v322_v24 = vpop.f32.mrb[6].mxu1 }
 0x2e3   :  { %325 = vst [vmem:[%s573_s7] sm:$0xff] %v320_v22  ;;  %v391_v25 = vpop.f32.mrb[7].mxu1 }

</bundles_post_ra>
